<compile_context>
chip_gen: v5e
topology: v5e:2x2
jax: 0.10.0
libtpu: 0.0.40
codegen_flags: <defaults>
</compile_context>

<pallas_src>
import jax
import jax.numpy as jnp
from jax.experimental import pallas as pl
from jax.experimental.pallas import tpu as pltpu


def _round_up(x, m):
    return ((x + m - 1) // m) * m


# ----------------------------------------------------------------------------
# Kernels
# ----------------------------------------------------------------------------

def _mlp_kernel_resident(x_ref,
                         w0_ref, b0_ref,
                         w1_ref, b1_ref,
                         w2_ref, b2_ref,
                         w3_ref, b3_ref,
                         out_ref):
    """Fused 4-layer MLP; one grid step per batch tile.

    W0 is VMEM-resident (constant index map), so there is no vocab grid axis,
    no accumulator scratch and no pl.when init/finalize split.  All matmuls
    accumulate in f32 on the MXU; bias adds / ReLU stay f32 on the VPU.
    """
    h = jnp.dot(x_ref[...], w0_ref[...], preferred_element_type=jnp.float32)
    h = jnp.maximum(h + b0_ref[...], 0.0)
    h = jnp.dot(h.astype(w1_ref.dtype), w1_ref[...],
                preferred_element_type=jnp.float32) + b1_ref[...]
    h = jnp.maximum(h, 0.0)
    h = jnp.dot(h.astype(w2_ref.dtype), w2_ref[...],
                preferred_element_type=jnp.float32) + b2_ref[...]
    h = jnp.maximum(h, 0.0)
    logits = jnp.dot(h.astype(w3_ref.dtype), w3_ref[...],
                     preferred_element_type=jnp.float32) + b3_ref[...]
    out_ref[...] = logits.astype(out_ref.dtype)


def _mlp_kernel_ktiled(x_ref,
                       w0_ref, b0_ref,
                       w1_ref, b1_ref,
                       w2_ref, b2_ref,
                       w3_ref, b3_ref,
                       out_ref,
                       acc_ref):
    """Fallback for very large vocab*H1.  Grid = (batch_tiles, k_tiles).

    Layer-0 partial products accumulate over the vocab (k) axis into a f32
    VMEM scratch; layers 1-3 and the lane-dense logits store run once per
    batch tile, on the last k step.  x arrives already in the compute dtype.
    """
    k = pl.program_id(1)

    @pl.when(k == 0)
    def _init():
        acc_ref[...] = jnp.zeros_like(acc_ref)

    acc_ref[...] += jnp.dot(x_ref[...], w0_ref[...],
                            preferred_element_type=jnp.float32)

    @pl.when(k == pl.num_programs(1) - 1)
    def _finalize():
        h = jnp.maximum(acc_ref[...] + b0_ref[...], 0.0)
        h = jnp.dot(h.astype(w1_ref.dtype), w1_ref[...],
                    preferred_element_type=jnp.float32) + b1_ref[...]
        h = jnp.maximum(h, 0.0)
        h = jnp.dot(h.astype(w2_ref.dtype), w2_ref[...],
                    preferred_element_type=jnp.float32) + b2_ref[...]
        h = jnp.maximum(h, 0.0)
        logits = jnp.dot(h.astype(w3_ref.dtype), w3_ref[...],
                         preferred_element_type=jnp.float32) + b3_ref[...]
        out_ref[...] = logits.astype(out_ref.dtype)


# ----------------------------------------------------------------------------
# Parameter preparation (one-time, hoisted out of the per-forward path)
# ----------------------------------------------------------------------------

def _vmem_limit_bytes():
    """Generation-gated scoped-VMEM limit.

    v5e/v6e have 128 MiB physical VMEM (1 TensorCore) -> use 96 MiB.
    v7x (or unknown hardware) has 64 MiB per TC        -> stay at 48 MiB.
    """
    cap = None
    try:
        cap = int(pltpu.get_tpu_info().vmem_capacity_bytes)
    except Exception:
        cap = None
    if cap is not None and cap >= 100 * 1024 * 1024:
        return 96 * 1024 * 1024
    return 48 * 1024 * 1024


def prepare_params(params, *, use_bf16=True, k_tile=4096, force_k_tiled=False):
    """One-time weight preparation.

    params: 4 (W, b) pairs in PyTorch layout, W (out, in), b (out,).
    Weights are transposed to (in, out), hidden / class dims are zero-padded to
    multiples of 128 (exact: padded units get zero weights + zero bias ->
    ReLU(0)=0 -> no downstream contribution), and weights are optionally cast
    to bf16 for the MXU.  Biases stay f32, shaped (1, out).
    """
    assert len(params) == 4, "expected 3 hidden Linear layers + output Linear"
    wdt = jnp.bfloat16 if use_bf16 else jnp.float32
    (w0, b0), (w1, b1), (w2, b2), (w3, b3) = [
        (jnp.asarray(w, jnp.float32), jnp.asarray(b, jnp.float32))
        for (w, b) in params]

    vocab = w0.shape[1]
    num_classes = w3.shape[0]
    h1, h2, h3 = w0.shape[0], w1.shape[0], w2.shape[0]
    h1p, h2p, h3p = (_round_up(max(d, 128), 128) for d in (h1, h2, h3))
    c_pad = _round_up(max(num_classes, 128), 128)

    vmem_limit = _vmem_limit_bytes()
    itemsize = jnp.dtype(wdt).itemsize
    # W0 is resident if it fits comfortably even when conservatively budgeted
    # with the default 2x buffering (constant index map -> fetched only once).
    w0_resident = (not force_k_tiled) and (
        2 * vocab * h1p * itemsize <= int(0.4 * vmem_limit))

    if w0_resident:
        kt = vocab                 # whole vocab in one block
        v_pad = vocab              # no vocab padding needed
    else:
        kt = min(_round_up(k_tile, 128), _round_up(vocab, 128))
        v_pad = _round_up(vocab, kt)

    def pad2(w, rows, cols):
        return jnp.zeros((rows, cols), jnp.float32).at[:w.shape[0], :w.shape[1]].set(w)

    w0t = pad2(w0.T, v_pad, h1p).astype(wdt)
    w1t = pad2(w1.T, h1p, h2p).astype(wdt)
    w2t = pad2(w2.T, h2p, h3p).astype(wdt)
    w3t = pad2(w3.T, h3p, c_pad).astype(wdt)

    b0r = jnp.zeros((1, h1p), jnp.float32).at[:, :h1].set(b0.reshape(1, -1))
    b1r = jnp.zeros((1, h2p), jnp.float32).at[:, :h2].set(b1.reshape(1, -1))
    b2r = jnp.zeros((1, h3p), jnp.float32).at[:, :h3].set(b2.reshape(1, -1))
    b3r = jnp.zeros((1, c_pad), jnp.float32).at[:, :num_classes].set(b3.reshape(1, -1))

    return dict(weights=(w0t, b0r, w1t, b1r, w2t, b2r, w3t, b3r),
                vocab=vocab, v_pad=v_pad, k_tile=kt,
                num_classes=num_classes, c_pad=c_pad,
                dims_padded=(h1p, h2p, h3p),
                compute_dtype=wdt, w0_resident=w0_resident,
                vmem_limit=vmem_limit)


# ----------------------------------------------------------------------------
# Forward wrapper
# ----------------------------------------------------------------------------

def _step_vmem_bytes(bt, k_cols, x_itemsize, w_itemsize,
                     h1p, h2p, h3p, c_pad, resident):
    """Conservative per-grid-step VMEM estimate (default double-buffering)."""
    x_tile = 2 * bt * k_cols * x_itemsize
    w0 = 2 * k_cols * h1p * w_itemsize
    small_w = 2 * (h1p * h2p + h2p * h3p + h3p * c_pad) * w_itemsize
    biases = 2 * (h1p + h2p + h3p + c_pad) * 4
    out_tile = 2 * bt * c_pad * 4
    acc = 0 if resident else bt * h1p * 4
    live = 3 * bt * max(h1p, h2p, h3p) * 4   # headroom for live f32 activations
    return x_tile + w0 + small_w + biases + out_tile + acc + live


def _choose_batch_tile(n, requested, fits):
    bt = min(requested, max(n, 8))
    if n >= 16:
        bt = min(bt, max(8, n // 2))     # keep >= 2 batch tiles for the 2-TC split
    bt = max(8, (bt // 8) * 8)
    while bt > 8 and not fits(bt):
        bt = max(8, (bt // 2 // 8) * 8)
    return bt


def seq2vec_nn_forward(x, prepared, *, batch_tile=None):
    """x: (N, vocab) bag-of-words counts.  Returns (N, num_classes) f32 logits.

    Note: with the default bf16 compute dtype the wrapper-side input cast is
    exact only for counts < 256 (bf16 mantissa); typical bag-of-words counts
    satisfy this.  Use prepare_params(use_bf16=False) otherwise.
    """
    x = jnp.asarray(x)
    n, vocab = x.shape
    assert vocab == prepared["vocab"], "vocab mismatch with prepared params"

    cdt = prepared["compute_dtype"]
    h1p, h2p, h3p = prepared["dims_padded"]
    c_pad = prepared["c_pad"]
    num_classes = prepared["num_classes"]
    kt, v_pad = prepared["k_tile"], prepared["v_pad"]
    resident = prepared["w0_resident"]
    vmem_limit = prepared["vmem_limit"]
    w0t, b0, w1t, b1, w2t, b2, w3t, b3 = prepared["weights"]

    x_itemsize = jnp.dtype(cdt).itemsize
    w_itemsize = x_itemsize
    k_cols = v_pad if resident else kt

    if batch_tile is None:
        # v5e/v6e (96 MiB limit): big tiles to amortize overhead; v7x: smaller.
        batch_tile = 1024 if vmem_limit >= 96 * 1024 * 1024 else 512

    def fits(bt):
        return _step_vmem_bytes(bt, k_cols, x_itemsize, w_itemsize,
                                h1p, h2p, h3p, c_pad, resident) <= int(0.8 * vmem_limit)

    bt = _choose_batch_tile(n, batch_tile, fits)
    n_pad = _round_up(n, bt)

    # Fused pad + cast.  Casting to the compute dtype *before* padding halves
    # the bytes of the pre-kernel copy; with no padding needed this is a pure
    # element-wise cast (no extra full-array copy of x).
    xc = x.astype(cdt)
    if (n_pad, v_pad) != (n, vocab):
        xc = jnp.pad(xc, ((0, n_pad - n), (0, v_pad - vocab)))

    n_batch_tiles = n_pad // bt
    w0_bytes = int(w0t.size) * w0t.dtype.itemsize
    small_bytes = sum(int(a.size) * a.dtype.itemsize
                      for a in (b0, w1t, b1, w2t, b2, w3t, b3))
    flops = 2 * n_pad * (v_pad * h1p + h1p * h2p + h2p * h3p + h3p * c_pad)

    if resident:
        grid = (n_batch_tiles,)
        in_specs = [
            pl.BlockSpec((bt, v_pad), lambda i: (i, 0)),      # x (batch tiled)
            pl.BlockSpec((v_pad, h1p), lambda i: (0, 0)),     # W0 resident
            pl.BlockSpec((1, h1p), lambda i: (0, 0)),         # b0
            pl.BlockSpec((h1p, h2p), lambda i: (0, 0)),       # W1 resident
            pl.BlockSpec((1, h2p), lambda i: (0, 0)),         # b1
            pl.BlockSpec((h2p, h3p), lambda i: (0, 0)),       # W2 resident
            pl.BlockSpec((1, h3p), lambda i: (0, 0)),         # b2
            pl.BlockSpec((h3p, c_pad), lambda i: (0, 0)),     # W3 resident
            pl.BlockSpec((1, c_pad), lambda i: (0, 0)),       # b3
        ]
        out_spec = pl.BlockSpec((bt, c_pad), lambda i: (i, 0))
        scratch = []
        kernel = _mlp_kernel_resident
        semantics = ("parallel",)
        bytes_accessed = (n_pad * v_pad * x_itemsize + w0_bytes
                          + small_bytes + n_pad * c_pad * 4)
    else:
        grid = (n_batch_tiles, v_pad // kt)
        in_specs = [
            pl.BlockSpec((bt, kt), lambda i, k: (i, k)),      # x   (batch x K tiled)
            pl.BlockSpec((kt, h1p), lambda i, k: (k, 0)),     # W0  (K-streamed)
            pl.BlockSpec((1, h1p), lambda i, k: (0, 0)),      # b0
            pl.BlockSpec((h1p, h2p), lambda i, k: (0, 0)),    # W1  resident
            pl.BlockSpec((1, h2p), lambda i, k: (0, 0)),      # b1
            pl.BlockSpec((h2p, h3p), lambda i, k: (0, 0)),    # W2  resident
            pl.BlockSpec((1, h3p), lambda i, k: (0, 0)),      # b2
            pl.BlockSpec((h3p, c_pad), lambda i, k: (0, 0)),  # W3  resident
            pl.BlockSpec((1, c_pad), lambda i, k: (0, 0)),    # b3
        ]
        out_spec = pl.BlockSpec((bt, c_pad), lambda i, k: (i, 0))
        scratch = [pltpu.VMEM((bt, h1p), jnp.float32)]        # layer-0 accumulator
        kernel = _mlp_kernel_ktiled
        semantics = ("parallel", "arbitrary")
        # W0 is re-streamed once per batch tile in the tiled fallback.
        bytes_accessed = (n_pad * v_pad * x_itemsize + n_batch_tiles * w0_bytes
                          + small_bytes + n_pad * c_pad * 4)

    out = pl.pallas_call(
        kernel,
        out_shape=jax.ShapeDtypeStruct((n_pad, c_pad), jnp.float32),
        grid_spec=pltpu.PrefetchScalarGridSpec(
            num_scalar_prefetch=0,
            grid=grid,
            in_specs=in_specs,
            out_specs=out_spec,
            scratch_shapes=scratch),
        compiler_params=pltpu.CompilerParams(
            dimension_semantics=semantics,
            vmem_limit_bytes=vmem_limit),
        cost_estimate=pl.CostEstimate(flops=int(flops), transcendentals=0,
                                      bytes_accessed=int(bytes_accessed)),
    )(xc, w0t, b0, w1t, b1, w2t, b2, w3t, b3)

    # Drop batch padding and lane padding of the class dimension.
    return out[:n, :num_classes]


# ----------------------------------------------------------------------------
# Reference + self-test
# ----------------------------------------------------------------------------

def _init_linear(key, in_features, out_features):
    """Deterministic PyTorch-style init; W is (out, in)."""
    kw, kb = jax.random.split(key)
    bound = 1.0 / jnp.sqrt(jnp.float32(in_features))
    w = jax.random.uniform(kw, (out_features, in_features),
                           minval=-bound, maxval=bound, dtype=jnp.float32)
    b = jax.random.uniform(kb, (out_features,),
                           minval=-bound, maxval=bound, dtype=jnp.float32)
    return w, b


def _reference_forward(x, params):
    """Plain-JAX reference replicating the PyTorch forward exactly (f32)."""
    h = x
    for (w, b) in params[:-1]:
        h = jnp.maximum(h @ w.T + b, 0.0)
    w, b = params[-1]
    return h @ w.T + b


if __name__ == "__main__":
    # Small shapes consistent with the module's forward (bag-of-words -> logits).
    batch = 24
    vocab_size = 200                      # exercises batch/vocab padding paths
    num_neurons_per_layer = [128, 96, 64]  # exercises hidden-dim 128 padding
    num_classes = 10                      # exercises lane-dense class padding

    key = jax.random.PRNGKey(0)
    k_in, k_p = jax.random.split(key)

    # Bag-of-words counts (torch LongTensor); Linear needs float -> cast.
    x_counts = jax.random.randint(k_in, (batch, vocab_size), 0, 5, dtype=jnp.int32)
    x = x_counts.astype(jnp.float32)

    dims = [vocab_size] + num_neurons_per_layer + [num_classes]
    pkeys = jax.random.split(k_p, len(dims) - 1)
    params = [_init_linear(pk, dims[i], dims[i + 1])
              for i, pk in enumerate(pkeys)]

    ref = _reference_forward(x, params)

    # f32, W0-resident fast path: matches the PyTorch/JAX reference tightly.
    prep_f32 = prepare_params(params, use_bf16=False)
    out_f32 = jax.block_until_ready(seq2vec_nn_forward(x, prep_f32))
    assert out_f32.shape == (batch, num_classes)
    assert jnp.allclose(out_f32, ref, atol=1e-3, rtol=1e-3), "f32 resident mismatch"

    # bf16-weight path (default, MXU-optimized): looser tolerance (bf16 weights).
    prep_bf16 = prepare_params(params, use_bf16=True)
    out_bf16 = jax.block_until_ready(seq2vec_nn_forward(x, prep_bf16))
    assert out_bf16.shape == (batch, num_classes)
    assert jnp.allclose(out_bf16, ref, atol=1e-1, rtol=5e-2), "bf16 resident mismatch"

    # Forced k-tiled fallback (the large-vocab code path), f32 for a tight check.
    prep_tiled = prepare_params(params, use_bf16=False,
                                force_k_tiled=True, k_tile=128)
    out_tiled = jax.block_until_ready(seq2vec_nn_forward(x, prep_tiled))
    assert out_tiled.shape == (batch, num_classes)
    assert jnp.allclose(out_tiled, ref, atol=1e-3, rtol=1e-3), "k-tiled mismatch"

    print("KERNEL_OK")
</pallas_src>

<mosaic_0001>
module attributes {stable_mosaic.version = 11 : i64} {
  func.func @_mlp_kernel_resident(%arg0: i32, %arg1: memref<8x200xf32, #tpu.memory_space<vmem>>, %arg2: memref<200x128xf32, #tpu.memory_space<vmem>>, %arg3: memref<1x128xf32, #tpu.memory_space<vmem>>, %arg4: memref<128x128xf32, #tpu.memory_space<vmem>>, %arg5: memref<1x128xf32, #tpu.memory_space<vmem>>, %arg6: memref<128x128xf32, #tpu.memory_space<vmem>>, %arg7: memref<1x128xf32, #tpu.memory_space<vmem>>, %arg8: memref<128x128xf32, #tpu.memory_space<vmem>>, %arg9: memref<1x128xf32, #tpu.memory_space<vmem>>, %arg10: memref<8x128xf32, #tpu.memory_space<vmem>>) attributes {dimension_semantics = [#tpu.dimension_semantics<parallel>], iteration_bounds = array<i64: 3>, scalar_prefetch = 0 : i64, scratch_operands = 0 : i64, tpu.core_type = #tpu.core_type<tc>, window_params = [{transform_indices = @transform_0, window_bounds = array<i64: 8, 200>}, {pipeline_mode = #tpu.pipeline_mode<synchronous>, transform_indices = @transform_1, window_bounds = array<i64: 200, 128>}, {pipeline_mode = #tpu.pipeline_mode<synchronous>, transform_indices = @transform_2, window_bounds = array<i64: 1, 128>}, {pipeline_mode = #tpu.pipeline_mode<synchronous>, transform_indices = @transform_3, window_bounds = array<i64: 128, 128>}, {pipeline_mode = #tpu.pipeline_mode<synchronous>, transform_indices = @transform_4, window_bounds = array<i64: 1, 128>}, {pipeline_mode = #tpu.pipeline_mode<synchronous>, transform_indices = @transform_5, window_bounds = array<i64: 128, 128>}, {pipeline_mode = #tpu.pipeline_mode<synchronous>, transform_indices = @transform_6, window_bounds = array<i64: 1, 128>}, {pipeline_mode = #tpu.pipeline_mode<synchronous>, transform_indices = @transform_7, window_bounds = array<i64: 128, 128>}, {pipeline_mode = #tpu.pipeline_mode<synchronous>, transform_indices = @transform_8, window_bounds = array<i64: 1, 128>}, {transform_indices = @transform_9, window_bounds = array<i64: 8, 128>}]} {
    %c0 = arith.constant 0 : index
    %c0_0 = arith.constant 0 : index
    %0 = vector.load %arg1[%c0, %c0_0] : memref<8x200xf32, #tpu.memory_space<vmem>>, vector<8x200xf32>
    %c0_1 = arith.constant 0 : index
    %c0_2 = arith.constant 0 : index
    %1 = vector.load %arg2[%c0_1, %c0_2] : memref<200x128xf32, #tpu.memory_space<vmem>>, vector<200x128xf32>
    %cst = arith.constant dense<0.000000e+00> : vector<8x128xf32>
    %2 = tpu.matmul %0, %1, %cst {dimension_numbers = #tpu.dot_dimension_numbers<[1], [0], [0], [1], [0, 0, 1, 1], [], []>} : vector<8x200xf32>, vector<200x128xf32>, vector<8x128xf32> -> vector<8x128xf32>
    %c0_3 = arith.constant 0 : index
    %c0_4 = arith.constant 0 : index
    %3 = vector.load %arg3[%c0_3, %c0_4] : memref<1x128xf32, #tpu.memory_space<vmem>>, vector<1x128xf32>
    %4 = vector.broadcast %3 : vector<1x128xf32> to vector<8x128xf32>
    %5 = arith.addf %2, %4 : vector<8x128xf32>
    %cst_5 = arith.constant 0.000000e+00 : f32
    %6 = vector.broadcast %cst_5 : f32 to vector<8x128xf32>
    %7 = arith.maximumf %5, %6 : vector<8x128xf32>
    %c0_6 = arith.constant 0 : index
    %c0_7 = arith.constant 0 : index
    %8 = vector.load %arg4[%c0_6, %c0_7] : memref<128x128xf32, #tpu.memory_space<vmem>>, vector<128x128xf32>
    %cst_8 = arith.constant dense<0.000000e+00> : vector<8x128xf32>
    %9 = tpu.matmul %7, %8, %cst_8 {dimension_numbers = #tpu.dot_dimension_numbers<[1], [0], [0], [1], [0, 0, 1, 1], [], []>} : vector<8x128xf32>, vector<128x128xf32>, vector<8x128xf32> -> vector<8x128xf32>
    %c0_9 = arith.constant 0 : index
    %c0_10 = arith.constant 0 : index
    %10 = vector.load %arg5[%c0_9, %c0_10] : memref<1x128xf32, #tpu.memory_space<vmem>>, vector<1x128xf32>
    %11 = vector.broadcast %10 : vector<1x128xf32> to vector<8x128xf32>
    %12 = arith.addf %9, %11 : vector<8x128xf32>
    %cst_11 = arith.constant 0.000000e+00 : f32
    %13 = vector.broadcast %cst_11 : f32 to vector<8x128xf32>
    %14 = arith.maximumf %12, %13 : vector<8x128xf32>
    %c0_12 = arith.constant 0 : index
    %c0_13 = arith.constant 0 : index
    %15 = vector.load %arg6[%c0_12, %c0_13] : memref<128x128xf32, #tpu.memory_space<vmem>>, vector<128x128xf32>
    %cst_14 = arith.constant dense<0.000000e+00> : vector<8x128xf32>
    %16 = tpu.matmul %14, %15, %cst_14 {dimension_numbers = #tpu.dot_dimension_numbers<[1], [0], [0], [1], [0, 0, 1, 1], [], []>} : vector<8x128xf32>, vector<128x128xf32>, vector<8x128xf32> -> vector<8x128xf32>
    %c0_15 = arith.constant 0 : index
    %c0_16 = arith.constant 0 : index
    %17 = vector.load %arg7[%c0_15, %c0_16] : memref<1x128xf32, #tpu.memory_space<vmem>>, vector<1x128xf32>
    %18 = vector.broadcast %17 : vector<1x128xf32> to vector<8x128xf32>
    %19 = arith.addf %16, %18 : vector<8x128xf32>
    %cst_17 = arith.constant 0.000000e+00 : f32
    %20 = vector.broadcast %cst_17 : f32 to vector<8x128xf32>
    %21 = arith.maximumf %19, %20 : vector<8x128xf32>
    %c0_18 = arith.constant 0 : index
    %c0_19 = arith.constant 0 : index
    %22 = vector.load %arg8[%c0_18, %c0_19] : memref<128x128xf32, #tpu.memory_space<vmem>>, vector<128x128xf32>
    %cst_20 = arith.constant dense<0.000000e+00> : vector<8x128xf32>
    %23 = tpu.matmul %21, %22, %cst_20 {dimension_numbers = #tpu.dot_dimension_numbers<[1], [0], [0], [1], [0, 0, 1, 1], [], []>} : vector<8x128xf32>, vector<128x128xf32>, vector<8x128xf32> -> vector<8x128xf32>
    %c0_21 = arith.constant 0 : index
    %c0_22 = arith.constant 0 : index
    %24 = vector.load %arg9[%c0_21, %c0_22] : memref<1x128xf32, #tpu.memory_space<vmem>>, vector<1x128xf32>
    %25 = vector.broadcast %24 : vector<1x128xf32> to vector<8x128xf32>
    %26 = arith.addf %23, %25 : vector<8x128xf32>
    %c0_23 = arith.constant 0 : index
    %c0_24 = arith.constant 0 : index
    %27 = vector.load %arg10[%c0_23, %c0_24] : memref<8x128xf32, #tpu.memory_space<vmem>>, vector<8x128xf32>
    tpu.vector_store %arg10[%c0_23, %c0_24], %26 {strides = array<i32>} : memref<8x128xf32, #tpu.memory_space<vmem>>, vector<8x128xf32>,
    return
  }
  func.func @transform_0(%arg0: i32) -> (i32, i32) {
    %c0_i32 = arith.constant 0 : i32
    %c0_i32_0 = arith.constant 0 : i32
    return %arg0, %c0_i32 : i32, i32
  }
  func.func @transform_1(%arg0: i32) -> (i32, i32) {
    %c0_i32 = arith.constant 0 : i32
    %c0_i32_0 = arith.constant 0 : i32
    %c0_i32_1 = arith.constant 0 : i32
    return %c0_i32, %c0_i32_0 : i32, i32
  }
  func.func @transform_2(%arg0: i32) -> (i32, i32) {
    %c0_i32 = arith.constant 0 : i32
    %c0_i32_0 = arith.constant 0 : i32
    %c0_i32_1 = arith.constant 0 : i32
    return %c0_i32, %c0_i32_0 : i32, i32
  }
  func.func @transform_3(%arg0: i32) -> (i32, i32) {
    %c0_i32 = arith.constant 0 : i32
    %c0_i32_0 = arith.constant 0 : i32
    %c0_i32_1 = arith.constant 0 : i32
    return %c0_i32, %c0_i32_0 : i32, i32
  }
  func.func @transform_4(%arg0: i32) -> (i32, i32) {
    %c0_i32 = arith.constant 0 : i32
    %c0_i32_0 = arith.constant 0 : i32
    %c0_i32_1 = arith.constant 0 : i32
    return %c0_i32, %c0_i32_0 : i32, i32
  }
  func.func @transform_5(%arg0: i32) -> (i32, i32) {
    %c0_i32 = arith.constant 0 : i32
    %c0_i32_0 = arith.constant 0 : i32
    %c0_i32_1 = arith.constant 0 : i32
    return %c0_i32, %c0_i32_0 : i32, i32
  }
  func.func @transform_6(%arg0: i32) -> (i32, i32) {
    %c0_i32 = arith.constant 0 : i32
    %c0_i32_0 = arith.constant 0 : i32
    %c0_i32_1 = arith.constant 0 : i32
    return %c0_i32, %c0_i32_0 : i32, i32
  }
  func.func @transform_7(%arg0: i32) -> (i32, i32) {
    %c0_i32 = arith.constant 0 : i32
    %c0_i32_0 = arith.constant 0 : i32
    %c0_i32_1 = arith.constant 0 : i32
    return %c0_i32, %c0_i32_0 : i32, i32
  }
  func.func @transform_8(%arg0: i32) -> (i32, i32) {
    %c0_i32 = arith.constant 0 : i32
    %c0_i32_0 = arith.constant 0 : i32
    %c0_i32_1 = arith.constant 0 : i32
    return %c0_i32, %c0_i32_0 : i32, i32
  }
  func.func @transform_9(%arg0: i32) -> (i32, i32) {
    %c0_i32 = arith.constant 0 : i32
    %c0_i32_0 = arith.constant 0 : i32
    return %arg0, %c0_i32 : i32, i32
  }
}

</mosaic_0001>

<bundles_post_ra>
// kernel: tpu_custom_call.1
= control target key start
LH: loop header
LB: loop body
LE: loop exit
PB: predicated region body
PF: predicated region fallthrough
CT: control target
= control target key end

     0   :  { %s1320_s0 = inlined_call_operand.hbm [shape: f32[24,200], index: 0, kind: input, shape index: {}]   ;;  %s1321_s1 = inlined_call_operand.hbm [shape: f32[200,128], index: 1, kind: input, shape index: {}]   ;;  %s1322_s2 = inlined_call_operand.vmem [shape: f32[1,128], index: 2, kind: input, shape index: {}]   ;;  %s1323_s3 = inlined_call_operand.hbm [shape: f32[128,128], index: 3, kind: input, shape index: {}]   ;;  %s1324_s4 = inlined_call_operand.vmem [shape: f32[1,128], index: 4, kind: input, shape index: {}]   ;;  %s1325_s5 = inlined_call_operand.hbm [shape: f32[128,128], index: 5, kind: input, shape index: {}]   ;;  %s1326_s6 = inlined_call_operand.vmem [shape: f32[1,128], index: 6, kind: input, shape index: {}]   ;;  %s1327_s7 = inlined_call_operand.hbm [shape: f32[128,128], index: 7, kind: input, shape index: {}]   ;;  %s1328_s8 = inlined_call_operand.vmem [shape: f32[1,128], index: 8, kind: input, shape index: {}]   ;;  %s1329_s9 = inlined_call_operand.hbm [shape: f32[24,128], index: 9, kind: output, shape index: {}]  }
   0x1   :  { %1330 = sst [smem:[#allocation16_spill]] %s1321_s1 }
   0x2   :  { %1331 = sst [smem:[#allocation17_spill]] %s1323_s3 }
   0x3   :  { %1332 = sst [smem:[#allocation18_spill]] %s1325_s5 }
   0x4   :  { %1333 = sst [smem:[#allocation19_spill]] %s1327_s7 }
   0x5   :  { %14 = vsyncpa [#allocation3], 0 }
   0x6   :  { %16 = vsyncpa [#allocation3 + $0x1], 0 }
   0x7   :  { %17 = vsyncpa [#allocation6], 0 }
   0x8   :  { %18 = vsyncpa [#allocation9], 0 }
   0x9   :  { %19 = vsyncpa [#allocation4], 0 }
   0xa   :  { %21 = vsyncpa [#allocation4 + $0x1], 0  ;;  %s1138_s30 = smov 0   ;;  %s1140_s10 = smov 0  }
   0xb   :  { %s1142_s11 = smov 0   ;;  %s1144_s12 = smov 0  }
   0xc LB: > { %s1334_s1 = sld [smem:[#allocation16_spill]]  ;;  %s1162_s16 = sadd.s32 4294967295, %s1080_s12   ;;  %s1080_s12 = sphi %s1144_s12, %s1348_s12   ;;  %s1076_s11 = sphi %s1142_s11, %s1347_s11   ;;  %s1072_s10 = sphi %s1140_s10, %s1346_s10   ;;  %s1068_s30 = sphi %s1138_s30, %s1345_s30  }
   0xd   : > { %p741_p0 = scmp.ge.s32.totalorder %s1080_s12, 1  ;;  %p48_p1 = scmp.eq.s32.totalorder %s1162_s16, 0 }
   0xe   : > { %p252_p2 = scmp.lt.s32.totalorder %s1080_s12, 4  ;;  %s1082_s18 = smov [#allocation5]  }
   0xf   : > { %s265_s19 = sshll.u32 %s1082_s18, 4  ;;  %s1336_s5 = sld [smem:[#allocation18_spill]]  ;;  %s266_s19 = int_to_ptr.vmem [resolvable:$true] %s265_s19 }
  0x10   : > { %p1167_p3 = pnand %p741_p0, %p252_p2  ;;  %s1338_s3 = sld [smem:[#allocation17_spill]] }
  0x11   : > { %s1083_s27 = smov [#allocation8]   ;;  %s1084_s29 = smov 128  }
  0x12   : > { %s263_s15 = sshll.u32 %s1334_s1, 4  ;;  %p783_p4 = pneg %p1167_p3  ;;  %s264_s15 = int_to_ptr.hbm [resolvable:$true] %s263_s15 }
  0x13   : > { %s299_s28 = sshll.u32 %s1083_s27, 4  ;;  %s1085_s13 = smov 8   ;;  %s300_s28 = int_to_ptr.vmem [resolvable:$true] %s299_s28 }
  0x14   : > { %p1178_p5 = pnand %p783_p4, %p48_p1  ;;  %s1339_s7 = sld [smem:[#allocation19_spill]] }
  0x15   : > { %s297_s22 = sshll.u32 %s1336_s5, 4  ;;  %s1086_s21 = smov [#allocation7]   ;;  %s298_s22 = int_to_ptr.hbm [resolvable:$true] %s297_s22 }
  0x16   : > { %s280_s26 = sshll.u32 %s1338_s3, 4  ;;  %s282_s24 = sshll.u32 %s1086_s21, 4  ;;  %s281_s26 = int_to_ptr.hbm [resolvable:$true] %s280_s26  ;;  %s283_s24 = int_to_ptr.vmem [resolvable:$true] %s282_s24 }
  0x17   : > { %786 = dma.hbm_to_vmem [thread:$0]  (!%p1178_p5), %s264_s15, 3200, %s266_s19, [#allocation6], %s1084_s29, %s1084_s29, %s1085_s13  }
  0x18   : > { %792 = dma.hbm_to_vmem [thread:$0]  (!%p1178_p5), %s298_s22, 2048, %s300_s28, [#allocation9], %s1084_s29, %s1084_s29, %s1085_s13  }
  0x19   : > { %789 = dma.hbm_to_vmem [thread:$0]  (!%p1178_p5), %s281_s26, 2048, %s283_s24, [#allocation6], %s1084_s29, %s1084_s29, %s1085_s13  }
  0x1a   : > { %s314_s20 = sshll.u32 %s1339_s7, 4  ;;  %s1087_s15 = smov [#allocation10]   ;;  %s315_s20 = int_to_ptr.hbm [resolvable:$true] %s314_s20 }
  0x1b   : > { %s316_s19 = sshll.u32 %s1087_s15, 4  ;;  %s740_s22 = sadd.s32 4294967294, %s1080_s12   ;;  %s317_s19 = int_to_ptr.vmem [resolvable:$true] %s316_s19 }
  0x1c   : > { %795 = dma.hbm_to_vmem [thread:$0]  (!%p1178_p5), %s315_s20, 2048, %s317_s19, [#allocation9], %s1084_s29, %s1084_s29, %s1085_s13  }
  0x1d   : > { %s1198_s25 = sadd.s32 1, %s1080_s12   ;;  %s34_s28 = sadd.s32 1, %s1076_s11 }
  0x1e   : > { %s31_s27 = ssub.s32 %s1080_s12, %s1198_s25  ;;  %p41_p7 = scmp.ne.s32.totalorder %s1076_s11, %s1072_s10 }
  0x1f   : > { %p32_p6 = scmp.eq.s32.totalorder %s31_s27, 0  ;;  %p42_p8 = scmp.eq.s32.totalorder %s1080_s12, 0 }
  0x20   : > { %p47_p9 = scmp.ne.s32.totalorder %s1072_s10, %s1068_s30  ;;  %p239_p12 = scmp.eq.s32.totalorder %s1162_s16, 2 }
  0x21   : > { %s1209_s26 = scalar_select %p32_p6, %s1076_s11, %s34_s28  }
  0x22   : > { %p1211_p10 = por %p42_p8, %p41_p7  ;;  %p1217_p11 = por %p48_p1, %p47_p9 }
  0x23   : > { %p245_p13 = scmp.eq.s32.totalorder %s740_s22, 2  ;;  %p808_p0 = scmp.lt.s32.totalorder %s1080_s12, 3 }
  0x24   : > { %s333_s29 = sand.u32 1, %s1076_s11   ;;  %p1224_p2 = por %p239_p12, %p41_p7 }
  0x25   : > { %p1228_p4 = por %p245_p13, %p47_p9  ;;  %s747_s20 = sshll.u32 %s333_s29, 4 }
  0x26   : > { %s762_s21 = sshll.u32 %s1080_s12, 4  ;;  %s337_s27 = scalar_lea.vmem [#allocation2], %s747_s20 }
  0x27   : > { %s342_s19 = scalar_lea.hbm %s1320_s0, %s762_s21  ;;  %s346_s28 = sshll.u32 %s337_s27, 4  ;;  %s347_s28 = int_to_ptr.vmem [resolvable:$true] %s346_s28 }
  0x28   : > { %s344_s1 = sshll.u32 %s342_s19, 4  ;;  %p1238_p5 = pnand %p808_p0, %p1211_p10  ;;  %s345_s1 = int_to_ptr.hbm [resolvable:$true] %s344_s1 }
  0x29   : > { %s334_s3 = scalar_lea.sflag [#allocation3], %s333_s29  ;;  %s976_s5 = sshra.s32 %s345_s1, 4  ;;  %s977_s5 = int_to_ptr.hbm [resolvable:$true] %s976_s5 }
  0x2a   : > { %s978_s7 = scalar_lea.hbm %s977_s5, 16  ;;  %p980_p7 = pneg %p1238_p5 }
  0x2b   : > { %p979_p6 = scmp.ne.s32.totalorder %s977_s5, %s978_s7  ;;  %s983_s24 = scalar_lea.hbm %s1320_s0, 48 }
  0x2c   : > { %p984_p10 = scmp.lt.s32.totalorder %s977_s5, %s1320_s0  ;;  %p985_p12 = scmp.lt.s32.totalorder %s983_s24, %s978_s7 }
  0x2d   : > { %p981_p8 = pnand %p980_p7, %p979_p6 }
  0x2e   : > { %p986_p13 = por %p985_p12, %p984_p10 }
  0x2f   : > { %p982_p9 = pneg %p981_p8 }
  0x31   : > { %p987_p0 = pnand %p986_p13, %p982_p9 }
  0x33   : > { %990 = shalt.err (!%p987_p0)
}
  0x34   : > { %799 = dma.hbm_to_vmem [thread:$0]  (!%p1238_p5), %s345_s1, 256, %s347_s28, %s334_s3  }
  0x35   : > { %355 = sbr.rel (%p1167_p3) target bundleno = 630 (0x276), region = 56  ;;  %s1255_s29 = sand.u32 (!%p1167_p3), 1, %s1072_s10  }
  0x36   : > { %s751_s19 = sshll.u32 (!%p1167_p3), %s1255_s29, 4  ;;  %s358_s27 = scalar_lea.sflag (!%p1167_p3), [#allocation3], %s1255_s29 }
  0x37   : > { %s1259_s20 = scalar_lea.vmem (!%p1167_p3), [#allocation2], %s751_s19 }
  0x3a   : > { %1051 = dma.done.wait (%p1217_p11), %s358_s27, 256  }
  0x3b   : > { %1053 = vsyncadd (%p1217_p11), %s358_s27, 4294967040 }
  0x3c   : > { %1055 = dma.done.wait (%p48_p1), [#allocation6], 5248  }
  0x3d   : > { %1057 = vsyncadd (%p48_p1), [#allocation6], 4294962048 }
  0x3e   : > { %1059 = dma.done.wait (%p48_p1), [#allocation9], 4096  }
  0x3f   : > { %1061 = vsyncadd (%p48_p1), [#allocation9], 4294963200  ;;  %v434_v0 = vld [vmem:[#allocation5 + $0x78] sm:$0xff]  ;;  %v433_v1 = vld [vmem:[#allocation5 + $0x70] sm:$0xff]  ;;  %vm448_vm0 = vcmask 588800   ;;  %s756_s28 = sshll.u32 %s1255_s29, 3 }
  0x40   : > { %452 = vmatpush.msra.mxu0 %v434_v0  ;;  %v432_v2 = vld [vmem:[#allocation5 + $0x68] sm:$0xff]  ;;  %v443_v3 = vld [vmem:[#allocation5 + $0xc0] sm:$0xff]  ;;  %v442_v4 = vld [vmem:[#allocation5 + $0xb8] sm:$0xff]  ;;  %s759_s22 = sshll.u32 %s1162_s16, 3  ;;  %s416_s27 = scalar_lea.vmem [#allocation11], %s756_s28 }
  0x41   : > { %v431_v5 = vld [vmem:[#allocation5 + $0x60] sm:$0xff]  ;;  %479 = vmatpush.msra.mxu1 %v443_v3  ;;  %v441_v6 = vld [vmem:[#allocation5 + $0xb0] sm:$0xff]  ;;  %v430_v7 = vld [vmem:[#allocation5 + $0x58] sm:$0xff]  ;;  %s627_s15 = scalar_lea.hbm %s1329_s9, %s759_s22  ;;  %s617_s3 = scalar_lea.sflag [#allocation4], %s1255_s29 }
  0x42   : > { %453 = vmatpush.msra.mxu0 %v433_v1  ;;  %v440_v8 = vld [vmem:[#allocation5 + $0xa8] sm:$0xff]  ;;  %v429_v9 = vld [vmem:[#allocation5 + $0x50] sm:$0xff]  ;;  %v439_v10 = vld [vmem:[#allocation5 + $0xa0] sm:$0xff]  ;;  %s631_s1 = sshll.u32 %s627_s15, 4  ;;  %s1026_s23 = scalar_lea.hbm %s1329_s9, 24  ;;  %s632_s1 = int_to_ptr.hbm [resolvable:$true] %s631_s1 }
  0x43   : > { %480 = vmatpush.msra.mxu1 %v442_v4  ;;  %v508_v11 = vld [vmem:[#allocation7 + $0x78] sm:$0xff]  ;;  %v507_v12 = vld [vmem:[#allocation7 + $0x70] sm:$0xff]  ;;  %v428_v13 = vld [vmem:[#allocation5 + $0x48] sm:$0xff]  ;;  %s1020_s5 = sshra.s32 %s632_s1, 4  ;;  %s1021_s5 = int_to_ptr.hbm [resolvable:$true] %s1020_s5 }
  0x44   : > { %454 = vmatpush.msra.mxu0 %v432_v2  ;;  %513 = vmatpush.msra.mxu2 %v508_v11  ;;  %v438_v14 = vld [vmem:[#allocation5 + $0x98] sm:$0xff]  ;;  %v506_v15 = vld [vmem:[#allocation7 + $0x68] sm:$0xff]  ;;  %v427_v16 = vld [vmem:[#allocation5 + $0x40] sm:$0xff]  ;;  %s1022_s16 = scalar_lea.hbm %s1021_s5, 8  ;;  %p1027_p5 = scmp.lt.s32.totalorder %s1021_s5, %s1329_s9 }
  0x45   : > { %481 = vmatpush.msra.mxu1 %v441_v6  ;;  %v437_v17 = vld [vmem:[#allocation5 + $0x90] sm:$0xff]  ;;  %v505_v18 = vld [vmem:[#allocation7 + $0x60] sm:$0xff]  ;;  %v426_v19 = vld [vmem:[#allocation5 + $0x38] sm:$0xff]  ;;  %p1023_p1 = scmp.ne.s32.totalorder %s1021_s5, %s1022_s16  ;;  %p1028_p6 = scmp.lt.s32.totalorder %s1026_s23, %s1022_s16 }
  0x46   : > { %455 = vmatpush.msra.mxu0 %v431_v5  ;;  %514 = vmatpush.msra.mxu2 %v507_v12  ;;  %v436_v20 = vld [vmem:[#allocation5 + $0x88] sm:$0xff]  ;;  %v504_v21 = vld [vmem:[#allocation7 + $0x58] sm:$0xff]  ;;  %v425_v22 = vld [vmem:[#allocation5 + $0x30] sm:$0xff] }
  0x47   : > { %482 = vmatpush.msra.mxu1 %v440_v8  ;;  %v435_v23 = vld [vmem:[#allocation5 + $0x80] sm:$0xff]  ;;  %v503_v24 = vld [vmem:[#allocation7 + $0x50] sm:$0xff]  ;;  %v424_v25 = vld [vmem:[#allocation5 + $0x28] sm:$0xff]  ;;  %p1024_p3 = pnand %p1023_p1, %p1224_p2  ;;  %p1029_p7 = por %p1028_p6, %p1027_p5 }
  0x48   : > { %456 = vmatpush.msra.mxu0 %v430_v7  ;;  %515 = vmatpush.msra.mxu2 %v506_v15  ;;  %v418_v26 = vld [vmem:[%s1259_s20 + $0x8] sm:$0xff]  ;;  %v502_v27 = vld [vmem:[#allocation7 + $0x48] sm:$0xff]  ;;  %v423_v28 = vld [vmem:[#allocation5 + $0x20] sm:$0xff] }
  0x49   : > { %483 = vmatpush.msra.mxu1 %v439_v10  ;;  %v501_v29 = vld [vmem:[#allocation7 + $0x40] sm:$0xff]  ;;  %v422_v30 = vld [vmem:[#allocation5 + $0x18] sm:$0xff]  ;;  %v500_v31 = vld [vmem:[#allocation7 + $0x38] sm:$0xff]  ;;  %p1025_p11 = pneg %p1024_p3 }
  0x4a   : > { %457 = vmatpush.msra.mxu0 %v429_v9  ;;  %516 = vmatpush.msra.mxu2 %v505_v18  ;;  %v421_v32 = vld [vmem:[#allocation5 + $0x10] sm:$0xff]  ;;  %v499_v33 = vld [vmem:[#allocation7 + $0x30] sm:$0xff]  ;;  %v420_v34 = vld [vmem:[#allocation5 + $0x8] sm:$0xff] }
  0x4b   : > { %484 = vmatpush.msra.mxu1 %v438_v14  ;;  %v498_v35 = vld [vmem:[#allocation7 + $0x28] sm:$0xff]  ;;  %v419_v36 = vld [vmem:[#allocation5] sm:$0xff]  ;;  %v497_v38 = vld [vmem:[#allocation7 + $0x20] sm:$0xff]  ;;  %p1030_p8 = pnand %p1029_p7, %p1025_p11 }
  0x4c   : > { %458 = vmatpush.msra.mxu0 %v428_v13  ;;  %517 = vmatpush.msra.mxu2 %v504_v21  ;;  %v417_v37 = vld [vmem:[%s1259_s20] sm:$0xff]  ;;  %v495_v40 = vld [vmem:[#allocation7 + $0x10] sm:$0xff]  ;;  %v493_v42 = vld [vmem:[#allocation7] sm:$0xff]  ;;  %s629_s20 = sshll.u32 %s416_s27, 4  ;;  %s630_s20 = int_to_ptr.vmem [resolvable:$true] %s629_s20 }
  0x4d   : > { %485 = vmatpush.msra.mxu1 %v437_v17  ;;  %v496_v39 = vld [vmem:[#allocation7 + $0x18] sm:$0xff]  ;;  %v494_v41 = vld [vmem:[#allocation7 + $0x8] sm:$0xff]  ;;  %v548_v44 = vld [vmem:[#allocation8 + $0x70] sm:$0xff] }
  0x4e   : > { %459 = vmatpush.msra.mxu0 %v427_v16  ;;  %518 = vmatpush.msra.mxu2 %v503_v24  ;;  %v549_v43 = vld [vmem:[#allocation8 + $0x78] sm:$0xff]  ;;  %v547_v45 = vld [vmem:[#allocation8 + $0x68] sm:$0xff]  ;;  %v546_v46 = vld [vmem:[#allocation8 + $0x60] sm:$0xff] }
  0x4f   : > { %486 = vmatpush.msra.mxu1 %v436_v20  ;;  %554 = vmatpush.msra.mxu3 %v549_v43  ;;  %v545_v47 = vld [vmem:[#allocation8 + $0x58] sm:$0xff]  ;;  %v544_v48 = vld [vmem:[#allocation8 + $0x50] sm:$0xff]  ;;  %v543_v49 = vld [vmem:[#allocation8 + $0x48] sm:$0xff] }
  0x50   : > { %460 = vmatpush.msra.mxu0 %v426_v19  ;;  %519 = vmatpush.msra.mxu2 %v502_v27  ;;  %v542_v50 = vld [vmem:[#allocation8 + $0x40] sm:$0xff]  ;;  %v541_v51 = vld [vmem:[#allocation8 + $0x38] sm:$0xff]  ;;  %v540_v52 = vld [vmem:[#allocation8 + $0x30] sm:$0xff] }
  0x51   : > { %487 = vmatpush.msra.mxu1 %v435_v23  ;;  %555 = vmatpush.msra.mxu3 %v548_v44  ;;  %v539_v53 = vld [vmem:[#allocation8 + $0x28] sm:$0xff]  ;;  %v538_v54 = vld [vmem:[#allocation8 + $0x20] sm:$0xff]  ;;  %v852_v55 = vld [vmem:[%s1322_s2] ss:$0 sm:$0xff] }
  0x52   : > { %461 = vmatpush.msra.mxu0 %v425_v22  ;;  %757 = vmatmul.msk.f32.vlgmr.msra.gmra.mxu1 %vm448_vm0, %v418_v26  ;;  %v537_v56 = vld [vmem:[#allocation8 + $0x18] sm:$0xff]  ;;  %v536_v62 = vld [vmem:[#allocation8 + $0x10] sm:$0xff]  ;;  %v535_v63 = vld [vmem:[#allocation8 + $0x8] sm:$0xff] }
  0x53   : > { %520 = vmatpush.msra.mxu2 %v501_v29  ;;  %556 = vmatpush.msra.mxu3 %v547_v45  ;;  %v534_v0 = vld [vmem:[#allocation8] sm:$0xff]  ;;  %v590_v1 = vld [vmem:[#allocation10 + $0x78] sm:$0xff]  ;;  %v589_v2 = vld [vmem:[#allocation10 + $0x70] sm:$0xff] }
  0x54   : > { %462 = vmatpush.msra.mxu0 %v424_v25  ;;  %595 = vmatpush.msrb.mxu1 %v590_v1  ;;  %v588_v3 = vld [vmem:[#allocation10 + $0x68] sm:$0xff]  ;;  %v587_v4 = vld [vmem:[#allocation10 + $0x60] sm:$0xff]  ;;  %v586_v5 = vld [vmem:[#allocation10 + $0x58] sm:$0xff] }
  0x55   : > { %521 = vmatpush.msra.mxu2 %v500_v31  ;;  %557 = vmatpush.msra.mxu3 %v546_v46  ;;  %v585_v6 = vld [vmem:[#allocation10 + $0x50] sm:$0xff]  ;;  %v584_v7 = vld [vmem:[#allocation10 + $0x48] sm:$0xff]  ;;  %v583_v8 = vld [vmem:[#allocation10 + $0x40] sm:$0xff] }
  0x56   : > { %463 = vmatpush.msra.mxu0 %v423_v28  ;;  %596 = vmatpush.msrb.mxu1 %v589_v2  ;;  %v582_v9 = vld [vmem:[#allocation10 + $0x38] sm:$0xff]  ;;  %v581_v10 = vld [vmem:[#allocation10 + $0x30] sm:$0xff]  ;;  %v580_v11 = vld [vmem:[#allocation10 + $0x28] sm:$0xff] }
  0x57   : > { %522 = vmatpush.msra.mxu2 %v499_v33  ;;  %558 = vmatpush.msra.mxu3 %v545_v47  ;;  %v579_v12 = vld [vmem:[#allocation10 + $0x20] sm:$0xff]  ;;  %v578_v13 = vld [vmem:[#allocation10 + $0x18] sm:$0xff]  ;;  %v577_v18 = vld [vmem:[#allocation10 + $0x10] sm:$0xff] }
  0x58   : > { %464 = vmatpush.msra.mxu0 %v422_v30  ;;  %597 = vmatpush.msrb.mxu1 %v588_v3  ;;  %v853_v14 = vld [vmem:[%s1324_s4] ss:$0 sm:$0xff]  ;;  %v576_v19 = vld [vmem:[#allocation10 + $0x8] sm:$0xff]  ;;  %v575_v20 = vld [vmem:[#allocation10] sm:$0xff] }
  0x59   : > { %523 = vmatpush.msra.mxu2 %v498_v35  ;;  %559 = vmatpush.msra.mxu3 %v544_v48  ;;  %v854_v21 = vld [vmem:[%s1326_s6] ss:$0 sm:$0xff] }
  0x5a   : > { %465 = vmatpush.msra.mxu0 %v421_v32  ;;  %598 = vmatpush.msrb.mxu1 %v587_v4  ;;  %v855_v25 = vld [vmem:[%s1328_s8] ss:$0 sm:$0xff] }
  0x5b   : > { %524 = vmatpush.msra.mxu2 %v497_v38  ;;  %560 = vmatpush.msra.mxu3 %v543_v49 }
  0x5c   : > { %466 = vmatpush.msra.mxu0 %v420_v34  ;;  %599 = vmatpush.msrb.mxu1 %v586_v5 }
  0x5d   : > { %525 = vmatpush.msra.mxu2 %v496_v39  ;;  %561 = vmatpush.msra.mxu3 %v542_v50 }
  0x5e   : > { %467 = vmatpush.msra.mxu0 %v419_v36  ;;  %600 = vmatpush.msrb.mxu1 %v585_v6 }
  0x5f   : > { %468 = vmatmul.f32.vlgmr.msra.gmra.mxu0 %v417_v37  ;;  %526 = vmatpush.msra.mxu2 %v495_v40 }
  0x60   : > { %562 = vmatpush.msra.mxu3 %v541_v51  ;;  %601 = vmatpush.msrb.mxu1 %v584_v7 }
  0x61   : > { %527 = vmatpush.msra.mxu2 %v494_v41 }
  0x62   : > { %563 = vmatpush.msra.mxu3 %v540_v52  ;;  %602 = vmatpush.msrb.mxu1 %v583_v8 }
  0x63   : > { %528 = vmatpush.msra.mxu2 %v493_v42 }
  0x64   : > { %564 = vmatpush.msra.mxu3 %v539_v53  ;;  %603 = vmatpush.msrb.mxu1 %v582_v9 }
  0x66   : > { %565 = vmatpush.msra.mxu3 %v538_v54  ;;  %604 = vmatpush.msrb.mxu1 %v581_v10 }
  0x68   : > { %566 = vmatpush.msra.mxu3 %v537_v56  ;;  %605 = vmatpush.msrb.mxu1 %v580_v11 }
  0x6a   : > { %567 = vmatpush.msra.mxu3 %v536_v62  ;;  %606 = vmatpush.msrb.mxu1 %v579_v12 }
  0x6c   : > { %568 = vmatpush.msra.mxu3 %v535_v63  ;;  %607 = vmatpush.msrb.mxu1 %v578_v13 }
  0x6e   : > { %569 = vmatpush.msra.mxu3 %v534_v0  ;;  %608 = vmatpush.msrb.mxu1 %v577_v18 }
  0x70   : > { %609 = vmatpush.msrb.mxu1 %v576_v19 }
  0x72   : > { %610 = vmatpush.msrb.mxu1 %v575_v20 }
  0xcf   : > { %v489_v58 = vpop.f32.mrf.mxu1 }
  0xdc   : > { %v469_v57 = vpop.f32.mrf.mxu0 }
  0xdd   : > { %v470_v59 = vadd.f32 %v852_v55, %v469_v57 }
  0xdf   : > { %v490_v60 = vadd.f32 %v489_v58, %v470_v59 }
  0xe1   : > { %v492_v61 = vmax.f32 %v490_v60, 0.0 }
  0xe3   : > { %529 = vmatmul.f32.vlgmr.msra.gmra.mxu2 %v492_v61 }
 0x166   : > { %v530_v15 = vpop.f32.mrf.mxu2 }
 0x167   : > { %v531_v16 = vadd.f32 %v853_v14, %v530_v15 }
 0x169   : > { %v533_v17 = vmax.f32 %v531_v16, 0.0 }
 0x16b   : > { %570 = vmatmul.f32.vlgmr.msra.gmra.mxu3 %v533_v17 }
 0x1ee   : > { %v571_v22 = vpop.f32.mrf.mxu3 }
 0x1ef   : > { %v572_v23 = vadd.f32 %v854_v21, %v571_v22 }
 0x1f1   : > { %v574_v24 = vmax.f32 %v572_v23, 0.0 }
 0x1f3   : > { %611 = vmatmul.f32.vlgmr.msrb.gmra.mxu1 %v574_v24 }
 0x270   : > { %v612_v26 = vpop.f32.mrf.mxu1 }
 0x271   : > { %v613_v27 = vadd.f32 %v855_v25, %v612_v26 }
 0x273   : > { %615 = vst [vmem:[%s416_s27] sm:$0xff] %v613_v27 }
 0x274   : > { %1033 = shalt.err (!%p1030_p8)
}
 0x275   : > { %781 = dma.vmem_to_hbm [thread:$0]  (%p1224_p2), %s630_s20, 128, %s632_s1, %s617_s3  }
 0x276 PF: > { %p813_p9 = scmp.ge.s32.totalorder %s1080_s12, 2  ;;  %s643_s29 = sand.u32 1, %s1068_s30  }
 0x277   : > { %s644_s21 = scalar_lea.sflag [#allocation4], %s643_s29 }
 0x278   : > { %p801_p10 = pnand %p813_p9, %p1228_p4 }
 0x27a   : > { %p802_p12 = pneg %p801_p10 }
 0x27c   : > { %1063 = dma.done.wait (%p802_p12), %s644_s21, 128  }
 0x27d   : > { %1065 = vsyncadd (%p802_p12), %s644_s21, 4294967168  ;;  %p24_p13 = scmp.ge.s32.totalorder %s1198_s25, 5   ;;  %s1345_s30 = smov %s1072_s10 }
 0x27e   : > { %s1346_s10 = smov %s1076_s11  ;;  %s1347_s11 = smov %s1209_s26 }
 0x27f   : > { %s1348_s12 = smov %s1198_s25  ;;  %26 = sbr.rel (!%p24_p13) target bundleno = 12 (0xc), region = 117 }
 0x284   :  { %650 = vsyncpa [#allocation3], 1 }
 0x285   :  { %652 = vsyncpa [#allocation3 + $0x1], 1 }
 0x286   :  { %653 = vsyncpa [#allocation6], 1 }
 0x287   :  { %654 = vsyncpa [#allocation9], 1 }
 0x288   :  { %655 = vsyncpa [#allocation4], 1 }
 0x289   :  { %657 = vsyncpa [#allocation4 + $0x1], 1 }

</bundles_post_ra>
